<compile_context>
chip_gen: v5e
topology: v5e:2x2
jax: 0.10.0
libtpu: 0.0.40
codegen_flags: <defaults>
</compile_context>

<pallas_src>
import jax
import jax.numpy as jnp
from jax import lax
from jax.experimental import pallas as pl
from jax.experimental.pallas import tpu as pltpu


def _round_up(x, m):
    return (x + m - 1) // m * m


def _cdiv(a, b):
    return -(-a // b)


def _vmem_tile_bytes(rows, cols, itemsize=4):
    """Physical VMEM footprint of a 2-D f32/i32 buffer under (8,128) native tiling."""
    return _round_up(max(rows, 1), 8) * _round_up(max(cols, 1), 128) * itemsize


def pack_embedding2d_params(cont_weight, cat_tables):
    """One-time packing of layer weights (do at layer init, NOT per forward)."""
    cont_weight = jnp.asarray(cont_weight, jnp.float32)
    Dc, E = cont_weight.shape
    cards = [int(t.shape[0]) for t in cat_tables]
    # Pad each cardinality to a multiple of 128: lane-dense one-hot compares and
    # an unmasked MXU contraction dim.
    card_pads = [_round_up(c, 128) for c in cards]
    row_offs, o = [], 0
    for cp in card_pads:
        row_offs.append(o)
        o += cp

    # Densely stacked categorical tables [sum(card_pad_i), E] -- no Dout-wide
    # block-diagonal zero padding (factor-F smaller than the previous layout).
    # For an effective-bf16 embedding table, cast to bfloat16 here (halves the
    # resident VMEM; kept f32 to match the f32 reference check below).
    stacked = jnp.concatenate(
        [jnp.pad(jnp.asarray(t, jnp.float32), ((0, cp - c), (0, 0)))
         for t, c, cp in zip(cat_tables, cards, card_pads)], axis=0)

    # Continuous branch folded into a single matmul operand:
    #   wcexp[c, d*E + e] = (d == c) * cont_weight[c, e]
    # so  continuous @ wcexp == flattened continuous embedding (exactly one
    # nonzero term per output element -> no accumulation error).
    wcexp = jnp.einsum('cd,de->cde', jnp.eye(Dc, dtype=jnp.float32),
                       cont_weight).reshape(Dc, Dc * E)

    return dict(wcexp=wcexp, tables=stacked, cards=tuple(cards),
                card_pads=tuple(card_pads), row_offs=tuple(row_offs),
                Dc=Dc, E=E, n_cat=len(cards))


def _make_kernel(Dc, E, n_cat, card_pads, row_offs, Dout, Dout_pad):
    max_card_pad = max(card_pads)

    def kernel(cont_ref, cat_ref, wcexp_ref, tab_ref, out_ref):
        TB = cont_ref.shape[0]

        # Continuous part: one fused matmul [TB, Dc] @ [Dc, Dc*E].
        pieces = [jnp.dot(cont_ref[...], wcexp_ref[...],
                          preferred_element_type=jnp.float32)]

        # Categorical part: per-feature dense one-hot gather.  One hoisted iota;
        # each feature costs one VPU compare + one cast + one MXU matmul against
        # its own [card_pad_i, E] slice of the stacked table (contraction dim is
        # card_pad_i, not F*card -> no factor-F FLOP waste).
        iota = lax.broadcasted_iota(jnp.int32, (TB, max_card_pad), 1)
        cat = cat_ref[...]
        for i in range(n_cat):
            onehot = (iota[:, :card_pads[i]] == cat[:, i:i + 1]).astype(jnp.float32)
            tbl = tab_ref[row_offs[i]:row_offs[i] + card_pads[i], :]
            pieces.append(jnp.dot(onehot, tbl, preferred_element_type=jnp.float32))

        if Dout_pad > Dout:
            pieces.append(jnp.zeros((TB, Dout_pad - Dout), jnp.float32))

        # Single lane-dense store of the whole flattened tile.
        out_ref[...] = jnp.concatenate(pieces, axis=1).astype(out_ref.dtype)

        # Note: an out-of-range categorical index yields an all-zero embedding
        # row (benign) instead of PyTorch's failure mode.
        # TODO(synk): embedding_bias, shared_embedding_strategy (SharedEmbeddings),
        # BatchNorm1d(continuous) and embedding_dropout>0 are non-default /
        # training-time paths and are not implemented here.
        # TODO(synk): for very large per-feature cardinalities (avg card >> ~1k)
        # switch to a double-buffered HBM row gather (memory_space=pl.ANY +
        # scalar-prefetched indices + pltpu.make_async_copy) -- vectorized
        # jnp.take-style gathers do not currently lower in Mosaic for this pattern.

    return kernel


def embedding2d_forward(continuous, categorical, packed, *,
                        max_tile_b=2048, out_dtype=jnp.float32):
    """Pallas wrapper.

    continuous:  [B, Dc] float32
    categorical: [B, n_cat] int32 (column i takes values in [0, card_i))
    packed:      output of pack_embedding2d_params()
    returns:     [B, Dc + n_cat, E] out_dtype
    """
    continuous = jnp.asarray(continuous, jnp.float32)
    categorical = jnp.asarray(categorical, jnp.int32)
    B, Dc = continuous.shape
    n_cat = categorical.shape[1]
    assert Dc == packed["Dc"] and n_cat == packed["n_cat"]
    assert Dc > 0 and n_cat > 0  # TODO(synk): continuous-only / categorical-only inputs

    E = packed["E"]
    card_pads = packed["card_pads"]
    row_offs = packed["row_offs"]
    tables = packed["tables"]
    wcexp = packed["wcexp"]
    C_pad = tables.shape[0]
    max_card_pad = max(card_pads)

    F = Dc + n_cat
    Dout = F * E
    Dout_pad = _round_up(Dout, 128)          # lane-dense flattened output width

    # ---- tile-size & VMEM budget (re-derived per generation; v7x = 64 MiB) ----
    resident = _vmem_tile_bytes(C_pad, E) + _vmem_tile_bytes(Dc, Dc * E)

    def vmem_need(tb):
        io = (_vmem_tile_bytes(tb, Dc) + _vmem_tile_bytes(tb, n_cat)
              + _vmem_tile_bytes(tb, Dout_pad))
        interm = _vmem_tile_bytes(tb, max_card_pad) + _vmem_tile_bytes(tb, Dout_pad)
        # Budget 2x the grid-invariant (constant index_map) operands in case
        # Pallas double-buffers them; 2x the streamed I/O tiles for pipelining.
        return 2 * resident + 2 * io + interm

    tb = max(8, _round_up((1 << 20) // (Dout_pad * 4), 8))      # ~1 MiB output tile
    tb = min(tb, max_tile_b, _round_up(B, 8))
    if B > 8:
        tb = min(tb, _round_up(_cdiv(B, 2), 8))                 # >=2 grid steps (v7x: 2 TCs)
    tb = min(tb, _round_up(_cdiv(B, _cdiv(B, tb)), 8))          # avoid near-2x batch padding
    while tb > 8 and vmem_need(tb) > (48 << 20):                # v7x-safe VMEM ceiling
        tb = max(8, _round_up(tb // 2, 8))
    TB = tb
    B_pad = _round_up(B, TB)
    vmem_limit = int(min(64 << 20, max(vmem_need(TB) + (8 << 20), 32 << 20)))

    if B_pad != B:
        # Padded rows use categorical index 0 (a valid row); results are sliced off.
        continuous = jnp.pad(continuous, ((0, B_pad - B), (0, 0)))
        categorical = jnp.pad(categorical, ((0, B_pad - B), (0, 0)))

    kernel = _make_kernel(Dc, E, n_cat, card_pads, row_offs, Dout, Dout_pad)

    out_flat = pl.pallas_call(
        kernel,
        out_shape=jax.ShapeDtypeStruct((B_pad, Dout_pad), out_dtype),
        grid=(B_pad // TB,),
        in_specs=[
            pl.BlockSpec((TB, Dc), lambda b: (b, 0)),
            pl.BlockSpec((TB, n_cat), lambda b: (b, 0)),
            # Grid-invariant operands: constant index_map keeps them VMEM-resident
            # across grid steps (no per-step re-DMA).
            pl.BlockSpec((Dc, Dc * E), lambda b: (0, 0)),
            pl.BlockSpec((C_pad, E), lambda b: (0, 0)),
        ],
        out_specs=pl.BlockSpec((TB, Dout_pad), lambda b: (b, 0)),
        compiler_params=pltpu.CompilerParams(
            dimension_semantics=("parallel",),
            vmem_limit_bytes=vmem_limit),
    )(continuous, categorical, wcexp, tables)

    return out_flat[:B, :Dout].reshape(B, F, E)


def reference_forward(continuous, categorical, cont_weight, cat_tables):
    """Pure-JAX reference mirroring the PyTorch forward (default config)."""
    cont_embed = continuous[:, :, None] * cont_weight[None, :, :]
    cat_embed = jnp.stack(
        [cat_tables[i][categorical[:, i]] for i in range(len(cat_tables))],
        axis=1)
    return jnp.concatenate([cont_embed, cat_embed], axis=1)


if __name__ == "__main__":
    key = jax.random.PRNGKey(0)

    B = 8
    continuous_dim = 4
    categorical_cardinality = (5, 7, 11)
    embedding_dim = 16
    n_cat = len(categorical_cardinality)

    k_cont, k_cat, k_w, *k_tabs = jax.random.split(key, 3 + n_cat)

    continuous = jax.random.normal(k_cont, (B, continuous_dim), dtype=jnp.float32)
    cat_cols = [
        jax.random.randint(jax.random.fold_in(k_cat, i), (B,), 0, card,
                           dtype=jnp.int32)
        for i, card in enumerate(categorical_cardinality)
    ]
    categorical = jnp.stack(cat_cols, axis=1)                  # [B, n_cat]

    # nn.Embedding default init: N(0, 1). Deterministic via PRNGKey splits.
    cont_weight = jax.random.normal(k_w, (continuous_dim, embedding_dim),
                                    dtype=jnp.float32)
    cat_tables = [
        jax.random.normal(k_tabs[i], (card, embedding_dim), dtype=jnp.float32)
        for i, card in enumerate(categorical_cardinality)
    ]

    # Weight packing is hoisted out of the forward path (done once at "init").
    packed = pack_embedding2d_params(cont_weight, cat_tables)

    out = embedding2d_forward(continuous, categorical, packed)
    out = jax.block_until_ready(out)

    ref = reference_forward(continuous, categorical, cont_weight, cat_tables)
    assert out.shape == (B, continuous_dim + n_cat, embedding_dim)
    # Tolerance covers MXU multi-pass f32 vs VPU single-op rounding on the
    # continuous branch; categorical gathers are exact.
    assert jnp.allclose(out, ref, atol=1e-4, rtol=1e-4), "mismatch vs reference"

    print("KERNEL_OK")
</pallas_src>

<mosaic_0001>
module attributes {stable_mosaic.version = 11 : i64} {
  func.func @kernel(%arg0: i32, %arg1: memref<8x4xf32, #tpu.memory_space<vmem>>, %arg2: memref<8x3xi32, #tpu.memory_space<vmem>>, %arg3: memref<4x64xf32, #tpu.memory_space<vmem>>, %arg4: memref<384x16xf32, #tpu.memory_space<vmem>>, %arg5: memref<8x128xf32, #tpu.memory_space<vmem>>) attributes {dimension_semantics = [#tpu.dimension_semantics<parallel>], iteration_bounds = array<i64: 1>, scalar_prefetch = 0 : i64, scratch_operands = 0 : i64, tpu.core_type = #tpu.core_type<tc>, window_params = [{transform_indices = @transform_0, window_bounds = array<i64: 8, 4>}, {transform_indices = @transform_1, window_bounds = array<i64: 8, 3>}, {pipeline_mode = #tpu.pipeline_mode<synchronous>, transform_indices = @transform_2, window_bounds = array<i64: 4, 64>}, {pipeline_mode = #tpu.pipeline_mode<synchronous>, transform_indices = @transform_3, window_bounds = array<i64: 384, 16>}, {transform_indices = @transform_4, window_bounds = array<i64: 8, 128>}]} {
    %c0 = arith.constant 0 : index
    %c0_0 = arith.constant 0 : index
    %0 = vector.load %arg1[%c0, %c0_0] : memref<8x4xf32, #tpu.memory_space<vmem>>, vector<8x4xf32>
    %c0_1 = arith.constant 0 : index
    %c0_2 = arith.constant 0 : index
    %1 = vector.load %arg3[%c0_1, %c0_2] : memref<4x64xf32, #tpu.memory_space<vmem>>, vector<4x64xf32>
    %cst = arith.constant dense<0.000000e+00> : vector<8x64xf32>
    %2 = tpu.matmul %0, %1, %cst {dimension_numbers = #tpu.dot_dimension_numbers<[1], [0], [0], [1], [0, 0, 1, 1], [], []>} : vector<8x4xf32>, vector<4x64xf32>, vector<8x64xf32> -> vector<8x64xf32>
    %3 = tpu.iota {dimensions = array<i32: 1>} : vector<8x128xi32>
    %c0_3 = arith.constant 0 : index
    %c0_4 = arith.constant 0 : index
    %4 = vector.load %arg2[%c0_3, %c0_4] : memref<8x3xi32, #tpu.memory_space<vmem>>, vector<8x3xi32>
    %5 = vector.extract_strided_slice %4 {offsets = [0, 0], sizes = [8, 1], strides = [1, 1]} : vector<8x3xi32> to vector<8x1xi32>
    %6 = vector.broadcast %5 : vector<8x1xi32> to vector<8x128xi32>
    %7 = arith.cmpi eq, %3, %6 : vector<8x128xi32>
    %8 = arith.extui %7 : vector<8x128xi1> to vector<8x128xi32>
    %9 = arith.sitofp %8 : vector<8x128xi32> to vector<8x128xf32>
    %c0_5 = arith.constant 0 : index
    %c0_6 = arith.constant 0 : index
    %10 = vector.load %arg4[%c0_5, %c0_6] : memref<384x16xf32, #tpu.memory_space<vmem>>, vector<128x16xf32>
    %cst_7 = arith.constant dense<0.000000e+00> : vector<8x16xf32>
    %11 = tpu.matmul %9, %10, %cst_7 {dimension_numbers = #tpu.dot_dimension_numbers<[1], [0], [0], [1], [0, 0, 1, 1], [], []>} : vector<8x128xf32>, vector<128x16xf32>, vector<8x16xf32> -> vector<8x16xf32>
    %12 = vector.extract_strided_slice %4 {offsets = [0, 1], sizes = [8, 1], strides = [1, 1]} : vector<8x3xi32> to vector<8x1xi32>
    %13 = vector.broadcast %12 : vector<8x1xi32> to vector<8x128xi32>
    %14 = arith.cmpi eq, %3, %13 : vector<8x128xi32>
    %15 = arith.extui %14 : vector<8x128xi1> to vector<8x128xi32>
    %16 = arith.sitofp %15 : vector<8x128xi32> to vector<8x128xf32>
    %c128 = arith.constant 128 : index
    %c0_8 = arith.constant 0 : index
    %17 = vector.load %arg4[%c128, %c0_8] : memref<384x16xf32, #tpu.memory_space<vmem>>, vector<128x16xf32>
    %cst_9 = arith.constant dense<0.000000e+00> : vector<8x16xf32>
    %18 = tpu.matmul %16, %17, %cst_9 {dimension_numbers = #tpu.dot_dimension_numbers<[1], [0], [0], [1], [0, 0, 1, 1], [], []>} : vector<8x128xf32>, vector<128x16xf32>, vector<8x16xf32> -> vector<8x16xf32>
    %19 = vector.extract_strided_slice %4 {offsets = [0, 2], sizes = [8, 1], strides = [1, 1]} : vector<8x3xi32> to vector<8x1xi32>
    %20 = vector.broadcast %19 : vector<8x1xi32> to vector<8x128xi32>
    %21 = arith.cmpi eq, %3, %20 : vector<8x128xi32>
    %22 = arith.extui %21 : vector<8x128xi1> to vector<8x128xi32>
    %23 = arith.sitofp %22 : vector<8x128xi32> to vector<8x128xf32>
    %c256 = arith.constant 256 : index
    %c0_10 = arith.constant 0 : index
    %24 = vector.load %arg4[%c256, %c0_10] : memref<384x16xf32, #tpu.memory_space<vmem>>, vector<128x16xf32>
    %cst_11 = arith.constant dense<0.000000e+00> : vector<8x16xf32>
    %25 = tpu.matmul %23, %24, %cst_11 {dimension_numbers = #tpu.dot_dimension_numbers<[1], [0], [0], [1], [0, 0, 1, 1], [], []>} : vector<8x128xf32>, vector<128x16xf32>, vector<8x16xf32> -> vector<8x16xf32>
    %cst_12 = arith.constant 0.000000e+00 : f32
    %26 = vector.broadcast %cst_12 : f32 to vector<8x16xf32>
    %27 = tpu.concatenate %2, %11, %18, %25, %26 in 1 : vector<8x64xf32>, vector<8x16xf32>, vector<8x16xf32>, vector<8x16xf32>, vector<8x16xf32> -> vector<8x128xf32>
    %c0_13 = arith.constant 0 : index
    %c0_14 = arith.constant 0 : index
    %28 = vector.load %arg5[%c0_13, %c0_14] : memref<8x128xf32, #tpu.memory_space<vmem>>, vector<8x128xf32>
    tpu.vector_store %arg5[%c0_13, %c0_14], %27 {strides = array<i32>} : memref<8x128xf32, #tpu.memory_space<vmem>>, vector<8x128xf32>,
    return
  }
  func.func @transform_0(%arg0: i32) -> (i32, i32) {
    %c0_i32 = arith.constant 0 : i32
    %c0_i32_0 = arith.constant 0 : i32
    return %arg0, %c0_i32 : i32, i32
  }
  func.func @transform_1(%arg0: i32) -> (i32, i32) {
    %c0_i32 = arith.constant 0 : i32
    %c0_i32_0 = arith.constant 0 : i32
    return %arg0, %c0_i32 : i32, i32
  }
  func.func @transform_2(%arg0: i32) -> (i32, i32) {
    %c0_i32 = arith.constant 0 : i32
    %c0_i32_0 = arith.constant 0 : i32
    %c0_i32_1 = arith.constant 0 : i32
    return %c0_i32, %c0_i32_0 : i32, i32
  }
  func.func @transform_3(%arg0: i32) -> (i32, i32) {
    %c0_i32 = arith.constant 0 : i32
    %c0_i32_0 = arith.constant 0 : i32
    %c0_i32_1 = arith.constant 0 : i32
    return %c0_i32, %c0_i32_0 : i32, i32
  }
  func.func @transform_4(%arg0: i32) -> (i32, i32) {
    %c0_i32 = arith.constant 0 : i32
    %c0_i32_0 = arith.constant 0 : i32
    return %arg0, %c0_i32 : i32, i32
  }
}

</mosaic_0001>

<bundles_post_ra>
// kernel: tpu_custom_call.1
= control target key start
LH: loop header
LB: loop body
LE: loop exit
PB: predicated region body
PF: predicated region fallthrough
CT: control target
= control target key end

     0   :  { %v259_v2 = vmov 0   ;;  %v260_v3 = vmov 1   ;;  %v261_v17 = vmov 2   ;;  %s448_s0 = inlined_call_operand.vmem [shape: f32[8,4], index: 0, kind: input, shape index: {}]   ;;  %s449_s1 = inlined_call_operand.vmem [shape: s32[8,3], index: 1, kind: input, shape index: {}]   ;;  %s450_s2 = inlined_call_operand.vmem [shape: f32[4,64], index: 2, kind: input, shape index: {}]   ;;  %s451_s3 = inlined_call_operand.vmem [shape: f32[384,16], index: 3, kind: input, shape index: {}]   ;;  %s452_s4 = inlined_call_operand.hbm [shape: f32[8,128], index: 4, kind: output, shape index: {}]  }
   0x1   :  { %v50_v0 = vld [vmem:[%s449_s1] sm:$0xff]  ;;  %v72_v1 = vld [vmem:[%s451_s3 + $0x78] sm:$0xff]  ;;  %232 = vset.pattern.permute.xlu1 %v259_v2  ;;  %230 = vset.pattern.permute.xlu0 %v260_v3  ;;  %v71_v4 = vld [vmem:[%s451_s3 + $0x70] sm:$0xff] }
   0x2   :  { %52 = vperm.xlu1 %232, %v50_v0   ;;  %94 = vperm.xlu0 %230, %v50_v0   ;;  %v114_v5 = vld [vmem:[%s451_s3 + $0xf8] sm:$0xff]  ;;  %v113_v6 = vld [vmem:[%s451_s3 + $0xf0] sm:$0xff]  ;;  %v70_v7 = vld [vmem:[%s451_s3 + $0x68] sm:$0xff] }
   0x3   :  { %73 = vmatpush.msra.mxu1 %v72_v1  ;;  %115 = vmatpush.msra.mxu2 %v114_v5  ;;  %v112_v8 = vld [vmem:[%s451_s3 + $0xe8] sm:$0xff]  ;;  %v156_v9 = vld [vmem:[%s451_s3 + $0x178] sm:$0xff]  ;;  %v69_v10 = vld [vmem:[%s451_s3 + $0x60] sm:$0xff] }
   0x4   :  { %v111_v11 = vld [vmem:[%s451_s3 + $0xe0] sm:$0xff]  ;;  %157 = vmatpush.msra.mxu3 %v156_v9  ;;  %v155_v12 = vld [vmem:[%s451_s3 + $0x170] sm:$0xff]  ;;  %v154_v13 = vld [vmem:[%s451_s3 + $0x168] sm:$0xff] }
   0x5   :  { %74 = vmatpush.msra.mxu1 %v71_v4  ;;  %116 = vmatpush.msra.mxu2 %v113_v6  ;;  %v68_v14 = vld [vmem:[%s451_s3 + $0x58] sm:$0xff]  ;;  %v153_v16 = vld [vmem:[%s451_s3 + $0x160] sm:$0xff]  ;;  %v67_v18 = vld [vmem:[%s451_s3 + $0x50] sm:$0xff] }
   0x6   :  { %158 = vmatpush.msra.mxu3 %v155_v12  ;;  %v110_v15 = vld [vmem:[%s451_s3 + $0xd8] sm:$0xff] }
   0x7   :  { %75 = vmatpush.msra.mxu1 %v70_v7  ;;  %117 = vmatpush.msra.mxu2 %v112_v8 }
   0x8   :  { %159 = vmatpush.msra.mxu3 %v154_v13 }
   0x9   :  { %76 = vmatpush.msra.mxu1 %v69_v10  ;;  %118 = vmatpush.msra.mxu2 %v111_v11 }
   0xa   :  { %231 = vset.pattern.permute.xlu0 %v261_v17 }
   0xb   :  { %9 = vsyncpa [#allocation3], 0  ;;  %136 = vperm.xlu0 %231, %v50_v0   ;;  %77 = vmatpush.msra.mxu1 %v68_v14  ;;  %v109_v19 = vld [vmem:[%s451_s3 + $0xd0] sm:$0xff]  ;;  %v152_v20 = vld [vmem:[%s451_s3 + $0x158] sm:$0xff]  ;;  %vm24_vm0 = vcmask 1043456   ;;  %vm20_vm1 = vcmask 31744   ;;  %v48_v54 = vlaneseq }
   0xc   :  { %v66_v21 = vld [vmem:[%s451_s3 + $0x48] sm:$0xff]  ;;  %119 = vmatpush.msra.mxu2 %v110_v15  ;;  %160 = vmatpush.msra.mxu3 %v153_v16  ;;  %v65_v23 = vld [vmem:[%s451_s3 + $0x40] sm:$0xff]  ;;  %v64_v25 = vld [vmem:[%s451_s3 + $0x38] sm:$0xff]  ;;  %v262_v58 = vmov 1.0   ;;  %s263_s7 = smov 64   ;;  %s264_s8 = smov 80  }
   0xd   :  { %78 = vmatpush.msra.mxu1 %v67_v18  ;;  %v108_v22 = vld [vmem:[%s451_s3 + $0xc8] sm:$0xff]  ;;  %v107_v24 = vld [vmem:[%s451_s3 + $0xc0] sm:$0xff]  ;;  %v106_v26 = vld [vmem:[%s451_s3 + $0xb8] sm:$0xff]  ;;  %v49_v55 = vand.u32 127, %v48_v54  ;;  %vm189_vm5 = vcmask 523264   ;;  %vm191_vm6 = vcmask 654336  }
   0xe   :  { %120 = vmatpush.msra.mxu2 %v109_v19  ;;  %161 = vmatpush.msra.mxu3 %v152_v20  ;;  %v63_v27 = vld [vmem:[%s451_s3 + $0x30] sm:$0xff]  ;;  %v62_v29 = vld [vmem:[%s451_s3 + $0x28] sm:$0xff]  ;;  %v61_v30 = vld [vmem:[%s451_s3 + $0x20] sm:$0xff]  ;;  %vm193_vm7 = vcmask 785408   ;;  %s266_s9 = smov [#allocation2]   ;;  %s205_s13 = sshll.u32 %s452_s4, 4  ;;  %s206_s13 = int_to_ptr.hbm [resolvable:$true] %s205_s13 }
   0xf   :  { %79 = vmatpush.msra.mxu1 %v66_v21  ;;  %v105_v28 = vld [vmem:[%s451_s3 + $0xb0] sm:$0xff]  ;;  %v60_v31 = vld [vmem:[%s451_s3 + $0x18] sm:$0xff]  ;;  %v58_v33 = vld [vmem:[%s451_s3 + $0x8] sm:$0xff]  ;;  %s203_s10 = sshll.u32 %s266_s9, 4  ;;  %vm195_vm8 = vcmask 916480   ;;  %s204_s10 = int_to_ptr.vmem [resolvable:$true] %s203_s10 }
  0x10   :  { %121 = vmatpush.msra.mxu2 %v108_v22  ;;  %v59_v32 = vld [vmem:[%s451_s3 + $0x10] sm:$0xff]  ;;  %v57_v34 = vld [vmem:[%s451_s3] sm:$0xff]  ;;  %v104_v36 = vld [vmem:[%s451_s3 + $0xa8] sm:$0xff] }
  0x11   :  { %80 = vmatpush.msra.mxu1 %v65_v23  ;;  %v151_v35 = vld [vmem:[%s451_s3 + $0x150] sm:$0xff]  ;;  %v150_v37 = vld [vmem:[%s451_s3 + $0x148] sm:$0xff]  ;;  %v103_v38 = vld [vmem:[%s451_s3 + $0xa0] sm:$0xff] }
  0x12   :  { %122 = vmatpush.msra.mxu2 %v107_v24  ;;  %162 = vmatpush.msra.mxu3 %v151_v35  ;;  %v149_v39 = vld [vmem:[%s451_s3 + $0x140] sm:$0xff]  ;;  %v102_v40 = vld [vmem:[%s451_s3 + $0x98] sm:$0xff]  ;;  %v101_v42 = vld [vmem:[%s451_s3 + $0x90] sm:$0xff] }
  0x13   :  { %81 = vmatpush.msra.mxu1 %v64_v25  ;;  %v148_v41 = vld [vmem:[%s451_s3 + $0x138] sm:$0xff]  ;;  %v147_v43 = vld [vmem:[%s451_s3 + $0x130] sm:$0xff]  ;;  %v100_v44 = vld [vmem:[%s451_s3 + $0x88] sm:$0xff] }
  0x14   :  { %123 = vmatpush.msra.mxu2 %v106_v26  ;;  %163 = vmatpush.msra.mxu3 %v150_v37  ;;  %v146_v45 = vld [vmem:[%s451_s3 + $0x128] sm:$0xff]  ;;  %v99_v46 = vld [vmem:[%s451_s3 + $0x80] sm:$0xff]  ;;  %v144_v50 = vld [vmem:[%s451_s3 + $0x118] sm:$0xff] }
  0x15   :  { %82 = vmatpush.msra.mxu1 %v63_v27  ;;  %v145_v47 = vld [vmem:[%s451_s3 + $0x120] sm:$0xff]  ;;  %v143_v51 = vld [vmem:[%s451_s3 + $0x110] sm:$0xff]  ;;  %v142_v52 = vld [vmem:[%s451_s3 + $0x108] sm:$0xff] }
  0x16   :  { %124 = vmatpush.msra.mxu2 %v105_v28  ;;  %164 = vmatpush.msra.mxu3 %v149_v39  ;;  %v19_v48 = vld [vmem:[%s450_s2] sm:$0xf] }
  0x17   :  { %83 = vmatpush.msra.mxu1 %v62_v29  ;;  %v18_v49 = vld [vmem:[%s448_s0] sm:$0xff]  ;;  %214 = vmatpush.msk.msra.mxu0 %vm24_vm0, %v19_v48 }
  0x18   :  { %125 = vmatpush.msra.mxu2 %v104_v36  ;;  %165 = vmatpush.msra.mxu3 %v148_v41  ;;  %v141_v53 = vld [vmem:[%s451_s3 + $0x100] sm:$0xff]  ;;  %s265_s3 = smov 96  }
  0x19   :  { %84 = vmatpush.msra.mxu1 %v61_v30  ;;  %215 = vmatmul.msk.f32.vlgmr.msra.gmra.mxu0 %vm20_vm1, %v18_v49 }
  0x1a   :  { %126 = vmatpush.msra.mxu2 %v103_v38  ;;  %166 = vmatpush.msra.mxu3 %v147_v43 }
  0x1b   :  { %85 = vmatpush.msra.mxu1 %v60_v31 }
  0x1c   :  { %127 = vmatpush.msra.mxu2 %v102_v40  ;;  %167 = vmatpush.msra.mxu3 %v146_v45 }
  0x1d   :  { %86 = vmatpush.msra.mxu1 %v59_v32 }
  0x1e   :  { %128 = vmatpush.msra.mxu2 %v101_v42  ;;  %168 = vmatpush.msra.mxu3 %v145_v47 }
  0x1f   :  { %87 = vmatpush.msra.mxu1 %v58_v33 }
  0x20   :  { %129 = vmatpush.msra.mxu2 %v100_v44  ;;  %169 = vmatpush.msra.mxu3 %v144_v50 }
  0x21   :  { %88 = vmatpush.msra.mxu1 %v57_v34 }
  0x22   :  { %130 = vmatpush.msra.mxu2 %v99_v46  ;;  %170 = vmatpush.msra.mxu3 %v143_v51 }
  0x24   :  { %171 = vmatpush.msra.mxu3 %v142_v52 }
  0x26   :  { %172 = vmatpush.msra.mxu3 %v141_v53 }
  0x74   :  { %v53_v56 = vpop.permute.xlu1 %52  ;;  %v95_v57 = vpop.permute.xlu0 %94 }
  0x75   :  { %vm54_vm2 = vcmp.eq.s32.totalorder %v49_v55, %v53_v56  ;;  %vm96_vm3 = vcmp.eq.s32.totalorder %v49_v55, %v95_v57 }
  0x76   :  { %217 = vmatmul.msk.f32.vlgmr.msra.gmra.mxu1 %vm54_vm2, %v262_v58  ;;  %219 = vmatmul.msk.f32.vlgmr.msra.gmra.mxu2 %vm96_vm3, %v262_v58 }
  0x7d   :  { %v137_v59 = vpop.permute.xlu0 %136 }
  0x7e   :  { %vm138_vm4 = vcmp.eq.s32.totalorder %v49_v55, %v137_v59 }
  0x7f   :  { %221 = vmatmul.msk.f32.vlgmr.msra.gmra.mxu3 %vm138_vm4, %v262_v58 }
  0x96   :  { %v45_v0 = vpop.f32.mrf.mxu0 }
  0xf3   :  { %v90_v60 = vpop.f32.mrf.mxu1 }
  0xf4   :  { %178 = vrot.lane.b32.xlu1 %v90_v60, %s263_s7 }
  0xf9   :  { %v132_v61 = vpop.f32.mrf.mxu2 }
  0xfa   :  { %182 = vrot.lane.b32.xlu2 %v132_v61, %s264_s8 }
 0x102   :  { %v174_v62 = vpop.f32.mrf.mxu3 }
 0x103   :  { %186 = vrot.lane.b32.xlu2 %v174_v62, %s265_s3 }
 0x154   :  { %v183_v63 = vpop.permute.xlu2 %182 }
 0x15d   :  { %v187_v2 = vpop.permute.xlu2 %186 }
 0x166   :  { %v179_v1 = vpop.permute.xlu1 %178 }
 0x167   :  { %v190_v3 = vsel %vm189_vm5, %v45_v0, %v179_v1 }
 0x168   :  { %v192_v4 = vsel %vm191_vm6, %v190_v3, %v183_v63 }
 0x169   :  { %v194_v5 = vsel %vm193_vm7, %v192_v4, %v187_v2 }
 0x16a   :  { %v196_v6 = vsel %vm195_vm8, %v194_v5, 0.0 }
 0x16b   :  { %197 = vst [vmem:[#allocation2] sm:$0xff] %v196_v6 }
 0x16c   :  { %208 = dma.vmem_to_hbm [thread:$0]  %s204_s10, 128, %s206_s13, [#allocation3]  }
 0x16d   :  { %257 = dma.done.wait [#allocation3], 128  }
 0x16e   :  { %258 = vsyncadd [#allocation3], 4294967168 }
 0x16f   :  { %213 = vsyncpa [#allocation3], 1 }

</bundles_post_ra>
